<compile_context>
chip_gen: v7x
topology: tpu7x:2x2x1
jax: 0.10.0
libtpu: 0.0.40
codegen_flags: <defaults>
</compile_context>

<pallas_src>
import functools

import numpy as np
import jax
import jax.numpy as jnp
from jax import lax
from jax.experimental import pallas as pl
from jax.experimental.pallas import tpu as pltpu


def _pick_tile_m(m_total, target=256):
    """Row tile (multiple of 8) close to `target`, minimizing padding waste."""
    m8 = -(-m_total // 8) * 8                 # round rows up to multiple of 8
    m_tiles = max(1, -(-m8 // target))        # number of grid steps
    tile_m = -(-m8 // m_tiles)                # ceil split
    tile_m = -(-tile_m // 8) * 8              # keep sublane-aligned
    m_pad = tile_m * m_tiles
    return tile_m, m_tiles, m_pad


# ---------------------------------------------------------------------------
# Pallas kernel: one row-tile grid step.
#   x_ref     : (TILE_M, K_pad)   bf16  lane-packed im2row input rows
#   w_ref     : (K_pad, N_pad)    bf16  banded weights (BN scale folded in)
#   shift_ref : (1, N_pad)        f32   folded conv-bias + BN shift
#   o_ref     : (TILE_M, N_pad)         lane-dense output rows
# ---------------------------------------------------------------------------
def conv_bn_lrelu_kernel(x_ref, w_ref, shift_ref, o_ref):
    acc = jnp.dot(x_ref[...], w_ref[...],
                  preferred_element_type=jnp.float32)     # single deep-K GEMM
    acc = acc + shift_ref[...]                            # bias + BN shift
    acc = jnp.where(acc >= 0.0, acc, 0.2 * acc)           # LeakyReLU(0.2)
    o_ref[...] = acc.astype(o_ref.dtype)


# ---------------------------------------------------------------------------
# Wrapper: NCHW in / NCHW out (matches the PyTorch forward).
# ---------------------------------------------------------------------------
@functools.partial(jax.jit, static_argnames=("stride",))
def conv_block_forward(x_nchw, weight_oihw, bias, bn_gamma, bn_beta,
                       bn_mean, bn_var, *, stride=1):
    eps = 1e-5
    n, c_in, h, w = x_nchw.shape
    c_out = weight_oihw.shape[0]
    hp, wp = h + 2, w + 2
    h_out = (h - 1) // stride + 1
    w_out = (w - 1) // stride + 1
    wc_in = wp * c_in

    k_raw = 3 * wc_in
    k_pad = -(-k_raw // 128) * 128                 # K padded to lane multiple
    ncols = w_out * c_out
    ncols_pad = -(-ncols // 128) * 128             # lane-dense output width

    m_total = n * h_out                            # flat row axis (batch*rows)
    tile_m, m_tiles, m_pad = _pick_tile_m(m_total)

    # ---- layout glue (fused under this jit) ----
    x_nhwc = jnp.transpose(x_nchw, (0, 2, 3, 1))                  # (N,H,W,Cin)
    x_padded = jnp.pad(x_nhwc, ((0, 0), (1, 1), (1, 1), (0, 0)))  # (N,Hp,Wp,Cin)
    x_flat = x_padded.reshape(n, hp, wc_in)                       # packed rows

    # im2row: pack the 3 kh input rows of each output row along the lane axis.
    row_idx = (np.arange(h_out)[:, None] * stride
               + np.arange(3)[None, :]).reshape(-1)               # (H_out*3,)
    x_rows = x_flat[:, row_idx, :].reshape(n * h_out, k_raw)
    x_rows = jnp.pad(x_rows, ((0, m_pad - m_total), (0, k_pad - k_raw)))
    x_rows = x_rows.astype(jnp.bfloat16)                          # bf16 MXU op

    # Fold inference BN: out = conv(x; W*scale) + (beta + scale*(bias - mean))
    scale = (bn_gamma / jnp.sqrt(bn_var + eps)).astype(jnp.float32)
    shift = (bn_beta + scale * (bias - bn_mean)).astype(jnp.float32)

    # Banded weights (scale folded into columns):
    #   wband[kh*Wp*Cin + (wo*s+kw)*Cin + ci, wo*Cout + co] = W[kh,kw,ci,co]*scale[co]
    w_hwio = jnp.transpose(weight_oihw, (2, 3, 1, 0)).astype(jnp.float32)
    w_scaled = w_hwio * scale[None, None, None, :]                # (3,3,Cin,Cout)
    kh_i = np.arange(3)[:, None, None, None, None]
    kw_i = np.arange(3)[None, :, None, None, None]
    wo_i = np.arange(w_out)[None, None, :, None, None]
    ci_i = np.arange(c_in)[None, None, None, :, None]
    co_i = np.arange(c_out)[None, None, None, None, :]
    rows = kh_i * wc_in + (wo_i * stride + kw_i) * c_in + ci_i
    rows = np.broadcast_to(rows, (3, 3, w_out, c_in, c_out))
    cols = np.broadcast_to(wo_i * c_out + co_i, (3, 3, w_out, c_in, c_out))
    vals = jnp.broadcast_to(w_scaled[:, :, None, :, :],
                            (3, 3, w_out, c_in, c_out))
    wband = (jnp.zeros((k_pad, ncols_pad), jnp.float32)
             .at[rows, cols].set(vals)).astype(jnp.bfloat16)

    shift_row = jnp.pad(jnp.tile(shift, w_out), (0, ncols_pad - ncols))
    shift_row = shift_row.reshape(1, ncols_pad).astype(jnp.float32)

    # VMEM budget derived from the actual tiles (double-buffered) + headroom.
    out_itemsize = jnp.dtype(x_nchw.dtype).itemsize
    x_bytes = tile_m * k_pad * 2
    w_bytes = k_pad * ncols_pad * 2
    o_bytes = tile_m * ncols_pad * out_itemsize
    s_bytes = ncols_pad * 4
    vmem_limit = int(min(max(2 * (x_bytes + w_bytes + o_bytes + s_bytes)
                             + (4 << 20), 16 << 20), 64 << 20))

    out = pl.pallas_call(
        conv_bn_lrelu_kernel,
        out_shape=jax.ShapeDtypeStruct((m_pad, ncols_pad), x_nchw.dtype),
        grid_spec=pltpu.PrefetchScalarGridSpec(
            num_scalar_prefetch=0,
            grid=(m_tiles,),
            in_specs=[
                pl.BlockSpec((tile_m, k_pad), lambda i: (i, 0)),
                pl.BlockSpec((k_pad, ncols_pad), lambda i: (0, 0)),
                pl.BlockSpec((1, ncols_pad), lambda i: (0, 0)),
            ],
            out_specs=pl.BlockSpec((tile_m, ncols_pad), lambda i: (i, 0)),
        ),
        compiler_params=pltpu.CompilerParams(
            dimension_semantics=("parallel",),
            vmem_limit_bytes=vmem_limit),
    )(x_rows, wband, shift_row)

    out = out[:m_total, :ncols].reshape(n, h_out, w_out, c_out)
    return jnp.transpose(out, (0, 3, 1, 2))                       # back to NCHW


# ---------------------------------------------------------------------------
# Parameter init matching the module: kaiming_normal_(a=0.2), bias zeroed.
# ---------------------------------------------------------------------------
def init_params(key, c_in, c_out):
    fan_in = c_in * 3 * 3
    gain = float(np.sqrt(2.0 / (1.0 + 0.2 ** 2)))
    std = gain / float(np.sqrt(fan_in))
    weight = jax.random.normal(key, (c_out, c_in, 3, 3), jnp.float32) * std  # OIHW
    bias = jnp.zeros((c_out,), jnp.float32)
    return weight, bias


# ---------------------------------------------------------------------------
# Pure-JAX reference (XLA f32 conv + BN + LeakyReLU) for correctness check.
# ---------------------------------------------------------------------------
def reference_forward(x, weight, bias, gamma, beta, mean, var, *, stride=1):
    eps = 1e-5
    y = lax.conv_general_dilated(
        x, weight, window_strides=(stride, stride), padding=((1, 1), (1, 1)),
        dimension_numbers=("NCHW", "OIHW", "NCHW"))
    y = y + bias.reshape(1, -1, 1, 1)
    s = (gamma / jnp.sqrt(var + eps)).reshape(1, -1, 1, 1)
    y = s * (y - mean.reshape(1, -1, 1, 1)) + beta.reshape(1, -1, 1, 1)
    return jnp.where(y >= 0.0, y, 0.2 * y)


if __name__ == "__main__":
    key = jax.random.PRNGKey(0)
    kx, kw_, kg, kb, km, kv = jax.random.split(key, 6)

    # Small shapes consistent with the module: N=2, Cin=4, Cout=8, 16x16.
    N, C_IN, C_OUT, H, W = 2, 4, 8, 16, 16

    x = jax.random.normal(kx, (N, C_IN, H, W), jnp.float32)
    weight, bias = init_params(kw_, C_IN, C_OUT)
    # Non-trivial (inference) BatchNorm stats to exercise the folded BN path.
    gamma = 1.0 + 0.1 * jax.random.normal(kg, (C_OUT,), jnp.float32)
    beta = 0.1 * jax.random.normal(kb, (C_OUT,), jnp.float32)
    mean = 0.1 * jax.random.normal(km, (C_OUT,), jnp.float32)
    var = jax.random.uniform(kv, (C_OUT,), jnp.float32, minval=0.5, maxval=1.5)

    for s in (1, 2):
        out = conv_block_forward(x, weight, bias, gamma, beta, mean, var,
                                 stride=s)
        out = jax.block_until_ready(out)
        ref = jax.block_until_ready(
            reference_forward(x, weight, bias, gamma, beta, mean, var,
                              stride=s))
        # bf16 MXU operands vs f32 reference -> mixed-precision tolerance.
        np.testing.assert_allclose(np.asarray(out), np.asarray(ref),
                                   rtol=5e-2, atol=5e-2)

    print("KERNEL_OK")
</pallas_src>

<mosaic_0001>
module attributes {stable_mosaic.version = 11 : i64} {
  func.func @conv_bn_lrelu_kernel(%arg0: i32, %arg1: memref<32x256xbf16, #tpu.memory_space<vmem>>, %arg2: memref<256x128xbf16, #tpu.memory_space<vmem>>, %arg3: memref<1x128xf32, #tpu.memory_space<vmem>>, %arg4: memref<32x128xf32, #tpu.memory_space<vmem>>) attributes {dimension_semantics = [#tpu.dimension_semantics<parallel>], iteration_bounds = array<i64: 1>, scalar_prefetch = 0 : i64, scratch_operands = 0 : i64, tpu.core_type = #tpu.core_type<tc>, window_params = [{transform_indices = @transform_0, window_bounds = array<i64: 32, 256>}, {pipeline_mode = #tpu.pipeline_mode<synchronous>, transform_indices = @transform_1, window_bounds = array<i64: 256, 128>}, {pipeline_mode = #tpu.pipeline_mode<synchronous>, transform_indices = @transform_2, window_bounds = array<i64: 1, 128>}, {transform_indices = @transform_3, window_bounds = array<i64: 32, 128>}]} {
    %c0 = arith.constant 0 : index
    %c0_0 = arith.constant 0 : index
    %0 = vector.load %arg1[%c0, %c0_0] : memref<32x256xbf16, #tpu.memory_space<vmem>>, vector<32x256xbf16>
    %c0_1 = arith.constant 0 : index
    %c0_2 = arith.constant 0 : index
    %1 = vector.load %arg2[%c0_1, %c0_2] : memref<256x128xbf16, #tpu.memory_space<vmem>>, vector<256x128xbf16>
    %cst = arith.constant dense<0.000000e+00> : vector<32x128xf32>
    %2 = tpu.matmul %0, %1, %cst {dimension_numbers = #tpu.dot_dimension_numbers<[1], [0], [0], [1], [0, 0, 1, 1], [], []>} : vector<32x256xbf16>, vector<256x128xbf16>, vector<32x128xf32> -> vector<32x128xf32>
    %c0_3 = arith.constant 0 : index
    %c0_4 = arith.constant 0 : index
    %3 = vector.load %arg3[%c0_3, %c0_4] : memref<1x128xf32, #tpu.memory_space<vmem>>, vector<1x128xf32>
    %4 = vector.broadcast %3 : vector<1x128xf32> to vector<32x128xf32>
    %5 = arith.addf %2, %4 : vector<32x128xf32>
    %cst_5 = arith.constant 0.000000e+00 : f32
    %6 = vector.broadcast %cst_5 : f32 to vector<32x128xf32>
    %7 = arith.cmpf oge, %5, %6 : vector<32x128xf32>
    %cst_6 = arith.constant 2.000000e-01 : f32
    %8 = vector.broadcast %cst_6 : f32 to vector<32x128xf32>
    %9 = arith.mulf %8, %5 : vector<32x128xf32>
    %10 = arith.select %7, %5, %9 : vector<32x128xi1>, vector<32x128xf32>
    %c0_7 = arith.constant 0 : index
    %c0_8 = arith.constant 0 : index
    %11 = vector.load %arg4[%c0_7, %c0_8] : memref<32x128xf32, #tpu.memory_space<vmem>>, vector<32x128xf32>
    tpu.vector_store %arg4[%c0_7, %c0_8], %10 {strides = array<i32>} : memref<32x128xf32, #tpu.memory_space<vmem>>, vector<32x128xf32>,
    return
  }
  func.func @transform_0(%arg0: i32) -> (i32, i32) {
    %c0_i32 = arith.constant 0 : i32
    %c0_i32_0 = arith.constant 0 : i32
    return %arg0, %c0_i32 : i32, i32
  }
  func.func @transform_1(%arg0: i32) -> (i32, i32) {
    %c0_i32 = arith.constant 0 : i32
    %c0_i32_0 = arith.constant 0 : i32
    %c0_i32_1 = arith.constant 0 : i32
    return %c0_i32, %c0_i32_0 : i32, i32
  }
  func.func @transform_2(%arg0: i32) -> (i32, i32) {
    %c0_i32 = arith.constant 0 : i32
    %c0_i32_0 = arith.constant 0 : i32
    %c0_i32_1 = arith.constant 0 : i32
    return %c0_i32, %c0_i32_0 : i32, i32
  }
  func.func @transform_3(%arg0: i32) -> (i32, i32) {
    %c0_i32 = arith.constant 0 : i32
    %c0_i32_0 = arith.constant 0 : i32
    return %arg0, %c0_i32 : i32, i32
  }
}

</mosaic_0001>

<bundles_post_ra>
// kernel: tile.8
= control target key start
LH: loop header
LB: loop body
LE: loop exit
PB: predicated region body
PF: predicated region fallthrough
CT: control target
= control target key end

     0   :  { %s28_s0 = inlined_call_operand.vmem [shape: f32[8], index: 0, kind: input, shape index: {}]   ;;  %s29_s1 = inlined_call_operand.vmem [shape: f32[16,8], index: 1, kind: output, shape index: {}]  }
   0x1   :  { %v4_v0 = vld [vmem:[%s28_s0] ss:$0 sm:$0xff] }
   0x2   :  { %5 = vst [vmem:[%s29_s1] sm:$0xff] %v4_v0  ;;  %8 = vst [vmem:[%s29_s1 + $0x8] sm:$0xff] %v4_v0 }

// kernel: conv_block_forward.1
= control target key start
LH: loop header
LB: loop body
LE: loop exit
PB: predicated region body
PF: predicated region fallthrough
CT: control target
= control target key end

     0   :  { %s425_s1 = inlined_call_operand.vmem [shape: bf16[256,128], index: 1, kind: input, shape index: {}]   ;;  %s426_s0 = inlined_call_operand.vmem [shape: bf16[32,256], index: 0, kind: input, shape index: {}]   ;;  %s427_s2 = inlined_call_operand.vmem [shape: f32[1,128], index: 2, kind: input, shape index: {}]   ;;  %s428_s3 = inlined_call_operand.vmem [shape: f32[32,128], index: 3, kind: output, shape index: {}]  }
   0x1   :  { %v308_v0 = vld [vmem:[%s425_s1 + $0x40] sm:$0xff]   ;;  %v310_v2 = vld [vmem:[%s425_s1 + $0x48] sm:$0xff]   ;;  %v312_v4 = vld [vmem:[%s425_s1 + $0x50] sm:$0xff]  }
   0x2   :  { %v309_v1 = vld [vmem:[%s425_s1] sm:$0xff]   ;;  %264 = vmatprep.subr.bf16.mxu0 %v308_v0  ;;  %292 = vmatprep.subr.bf16.mxu1 %v308_v0  ;;  %v311_v3 = vld [vmem:[%s425_s1 + $0x8] sm:$0xff]   ;;  %v313_v5 = vld [vmem:[%s425_s1 + $0x10] sm:$0xff]  }
   0x3   :  { %265 = vmatpush3.bf16.msra.mxu0 %v309_v1  ;;  %300 = vmatpush3.bf16.msra.mxu1 %v309_v1  ;;  %v314_v6 = vld [vmem:[%s425_s1 + $0x58] sm:$0xff]   ;;  %v316_v8 = vld [vmem:[%s425_s1 + $0x60] sm:$0xff]   ;;  %v318_v10 = vld [vmem:[%s425_s1 + $0x68] sm:$0xff]  }
   0x4   :  { %266 = vmatprep.subr.bf16.mxu0 %v310_v2  ;;  %293 = vmatprep.subr.bf16.mxu1 %v310_v2  ;;  %v315_v7 = vld [vmem:[%s425_s1 + $0x18] sm:$0xff]   ;;  %v317_v9 = vld [vmem:[%s425_s1 + $0x20] sm:$0xff]   ;;  %v319_v13 = vld [vmem:[%s425_s1 + $0x28] sm:$0xff]  }
   0x5   :  { %v326_v11 = vld [vmem:[%s426_s0 + $0x4] ss:$8 sps:$4 sm:$0xff]   ;;  %v329_v12 = vld [vmem:[%s426_s0 + $0x14] ss:$8 sps:$4 sm:$0xff]   ;;  %v324_v18 = vld [vmem:[%s426_s0] ss:$8 sps:$4 sm:$0xff]  }
   0x6   :  { %v320_v14 = vld [vmem:[%s425_s1 + $0x70] sm:$0xff]   ;;  %206 = vmatprep.mubr.bf16.mxu0 %v326_v11  ;;  %214 = vmatprep.mubr.bf16.mxu1 %v329_v12  ;;  %v322_v16 = vld [vmem:[%s425_s1 + $0x78] sm:$0xff]   ;;  %v243_v22 = vld [vmem:[%s427_s2] ss:$0 sm:$0xff] }
   0x7   :  { %267 = vmatpush3.bf16.msra.mxu0 %v311_v3  ;;  %301 = vmatpush3.bf16.msra.mxu1 %v311_v3  ;;  %v321_v15 = vld [vmem:[%s425_s1 + $0x30] sm:$0xff]   ;;  %v323_v17 = vld [vmem:[%s425_s1 + $0x38] sm:$0xff]  }
   0x8   :  { %268 = vmatprep.subr.bf16.mxu0 %v312_v4  ;;  %294 = vmatprep.subr.bf16.mxu1 %v312_v4  ;;  %v327_v19 = vld [vmem:[%s426_s0 + $0x10] ss:$8 sps:$4 sm:$0xff]  }
   0xb   :  { %269 = vmatpush3.bf16.msra.mxu0 %v313_v5  ;;  %302 = vmatpush3.bf16.msra.mxu1 %v313_v5 }
   0xc   :  { %270 = vmatprep.subr.bf16.mxu0 %v314_v6  ;;  %295 = vmatprep.subr.bf16.mxu1 %v314_v6 }
   0xf   :  { %271 = vmatpush3.bf16.msra.mxu0 %v315_v7  ;;  %303 = vmatpush3.bf16.msra.mxu1 %v315_v7 }
  0x10   :  { %272 = vmatprep.subr.bf16.mxu0 %v316_v8  ;;  %296 = vmatprep.subr.bf16.mxu1 %v316_v8 }
  0x13   :  { %273 = vmatpush3.bf16.msra.mxu0 %v317_v9  ;;  %304 = vmatpush3.bf16.msra.mxu1 %v317_v9 }
  0x14   :  { %274 = vmatprep.subr.bf16.mxu0 %v318_v10  ;;  %297 = vmatprep.subr.bf16.mxu1 %v318_v10 }
  0x17   :  { %275 = vmatpush3.bf16.msra.mxu0 %v319_v13  ;;  %305 = vmatpush3.bf16.msra.mxu1 %v319_v13 }
  0x18   :  { %276 = vmatprep.subr.bf16.mxu0 %v320_v14  ;;  %298 = vmatprep.subr.bf16.mxu1 %v320_v14 }
  0x1b   :  { %277 = vmatpush3.bf16.msra.mxu0 %v321_v15  ;;  %306 = vmatpush3.bf16.msra.mxu1 %v321_v15 }
  0x1c   :  { %278 = vmatprep.subr.bf16.mxu0 %v322_v16  ;;  %299 = vmatprep.subr.bf16.mxu1 %v322_v16 }
  0x1f   :  { %279 = vmatpush3.bf16.msra.mxu0 %v323_v17  ;;  %307 = vmatpush3.bf16.msra.mxu1 %v323_v17 }
  0x22   :  { %207 = vmatmul.mubr.bf16.vlgmr.msra.gmra.mrb[0].mxu0 %v324_v18  ;;  %215 = vmatmul.mubr.bf16.vlgmr.msra.gmra.mrb[0].mxu1 %v327_v19 }
  0xf5   :  { %v280_v20 = vpop.f32.mrb[0].mxu0  ;;  %v286_v21 = vpop.f32.mrb[0].mxu1 }
  0xf6   :  { %v281_v23 = vpop.f32.mrb[1].mxu0  ;;  %v287_v24 = vpop.f32.mrb[1].mxu1 }
  0xf7   :  { %v282_v25 = vadd.f32 %v281_v23, %v280_v20  ;;  %v288_v26 = vadd.f32 %v287_v24, %v286_v21  ;;  %v283_v27 = vpop.f32.mrb[2].mxu0  ;;  %v289_v28 = vpop.f32.mrb[2].mxu1 }
  0xf8   :  { %v284_v29 = vpop.f32.mrb[3].mxu0  ;;  %v290_v30 = vpop.f32.mrb[3].mxu1 }
  0xf9   :  { %v209_v31 = vadd.f32 %v282_v25, %v243_v22  ;;  %v217_v32 = vadd.f32 %v288_v26, %v243_v22  ;;  %v285_v33 = vadd.f32 %v284_v29, %v283_v27  ;;  %v291_v34 = vadd.f32 %v290_v30, %v289_v28 }
  0xfb   :  { %vm223_vm0 = vcmp.ge.f32.partialorder %v209_v31, 0.0  ;;  %v227_v35 = vmul.f32 0.2, %v209_v31  ;;  %vm225_vm1 = vcmp.ge.f32.partialorder %v217_v32, 0.0  ;;  %v229_v36 = vmul.f32 0.2, %v217_v32 }
  0xfc   :  { %v212_v37 = vadd.f32 %v285_v33, %v243_v22  ;;  %v220_v38 = vadd.f32 %v291_v34, %v243_v22 }
  0xfd   :  { %v231_v39 = vsel %vm223_vm0, %v209_v31, %v227_v35  ;;  %v233_v40 = vsel %vm225_vm1, %v217_v32, %v229_v36 }
  0xfe   :  { %235 = vst [vmem:[%s428_s3] sm:$0xff] %v231_v39  ;;  %237 = vst [vmem:[%s428_s3 + $0x10] sm:$0xff] %v233_v40  ;;  %vm224_vm2 = vcmp.ge.f32.partialorder %v212_v37, 0.0  ;;  %v228_v41 = vmul.f32 0.2, %v212_v37  ;;  %vm226_vm3 = vcmp.ge.f32.partialorder %v220_v38, 0.0 }
  0xff   :  { %v230_v42 = vmul.f32 0.2, %v220_v38 }
 0x100   :  { %v232_v43 = vsel %vm224_vm2, %v212_v37, %v228_v41 }
 0x101   :  { %v234_v44 = vsel %vm226_vm3, %v220_v38, %v230_v42  ;;  %236 = vst [vmem:[%s428_s3 + $0x8] sm:$0xff] %v232_v43 }
 0x102   :  { %238 = vst [vmem:[%s428_s3 + $0x18] sm:$0xff] %v234_v44 }

</bundles_post_ra>
